<compile_context>
chip_gen: v7x
topology: tpu7x:2x2x1
jax: 0.10.0
libtpu: 0.0.40
codegen_flags: <defaults>
</compile_context>

<pallas_src>
import functools

import jax
import jax.numpy as jnp
from jax.experimental import pallas as pl
from jax.experimental.pallas import tpu as pltpu


def _round_up(v, m):
    return ((v + m - 1) // m) * m


# ---------------------------------------------------------------------------
# Small-shape path (the one exercised by this module: B=2, IN=4, OUT=2).
# Whole arrays live in VMEM as full blocks (the (8,128) divisibility rule is
# waived when block_shape equals the full array), single kernel invocation.
# ---------------------------------------------------------------------------
def _linear_stack_sum_small_kernel(x_ref, wt_ref, b_ref, o_ref):
    # x_ref: (B, IN), wt_ref: (IN, OUT) (= W^T), b_ref: (1, OUT), o_ref: (B, OUT)
    x = x_ref[...].astype(jnp.float32)
    wt = wt_ref[...].astype(jnp.float32)
    b = b_ref[...].astype(jnp.float32)

    # y = x @ W^T as an unrolled outer-product accumulation over the tiny,
    # statically-known IN axis: pure VPU broadcast multiply-adds, no MXU pass,
    # no padding, no reductions.
    acc = x[:, 0:1] * wt[0:1, :]                      # (B,1) * (1,OUT) -> (B,OUT)
    for k in range(1, x.shape[1]):
        acc = acc + x[:, k:k + 1] * wt[k:k + 1, :]

    # torch.stack((y, y, y, y), dim=0).sum(dim=0) == 4 * y  (kept in-kernel).
    o_ref[...] = (4.0 * (acc + b)).astype(o_ref.dtype)


def _small_path(x, weight, bias):
    B, IN = x.shape
    OUT = weight.shape[0]
    wt = weight.T                      # (IN, OUT): 32 B relayout, negligible
    b2 = bias.reshape(1, OUT)
    return pl.pallas_call(
        _linear_stack_sum_small_kernel,
        out_shape=jax.ShapeDtypeStruct((B, OUT), x.dtype),
    )(x, wt, b2)


# ---------------------------------------------------------------------------
# Tiled MXU fallback for realistic (large) shapes. Not traced at the module's
# tiny test shapes; kept as a parameterized path per the review.
# ---------------------------------------------------------------------------
def _linear_stack_sum_tiled_kernel(x_ref, w_ref, b_ref, o_ref, acc_ref):
    # x_ref: (tm, tk), w_ref: (tn, tk), b_ref: (1, tn), o_ref: (tm, tn)
    k = pl.program_id(2)

    @pl.when(k == 0)
    def _():
        acc_ref[...] = jnp.zeros_like(acc_ref)

    # x @ W^T: contract the IN axis of both operands directly (no weight transpose).
    acc_ref[...] += jax.lax.dot_general(
        x_ref[...], w_ref[...],
        dimension_numbers=(((1,), (1,)), ((), ())),
        preferred_element_type=jnp.float32,
    )

    # Canonical pattern: store every iteration; fold bias + *4 at the last k.
    o_ref[...] = acc_ref[...].astype(o_ref.dtype)

    @pl.when(k == pl.num_programs(2) - 1)
    def _():
        y = acc_ref[...] + b_ref[...].astype(jnp.float32)
        o_ref[...] = (4.0 * y).astype(o_ref.dtype)


def _tiled_path(x, weight, bias, tm=256, tn=256, tk=512):
    B, IN = x.shape
    OUT = weight.shape[0]

    M = _round_up(B, 8)
    N = _round_up(OUT, 128)
    K = _round_up(IN, 128)
    tm, tn, tk = min(tm, M), min(tn, N), min(tk, K)
    # Give megacore (v7x: 2 TCs) at least 2 parallel M-tiles when the batch allows.
    if M // tm < 2 and M >= 16:
        tm = max(8, _round_up(M // 2, 8))
    M, N, K = _round_up(M, tm), _round_up(N, tn), _round_up(K, tk)

    xp = x if (M, K) == (B, IN) else jnp.zeros((M, K), x.dtype).at[:B, :IN].set(x)
    wp = (weight if (N, K) == (OUT, IN)
          else jnp.zeros((N, K), weight.dtype).at[:OUT, :IN].set(weight))
    bp = jnp.zeros((1, N), bias.dtype).at[0, :OUT].set(bias)

    # VMEM request derived from the real footprint (double-buffered inputs +
    # double-buffered output + f32 accumulator), with margin, capped at 32 MiB.
    itemsize = jnp.dtype(x.dtype).itemsize
    vmem_need = (2 * (tm * tk + tn * tk + tn) * itemsize
                 + 2 * tm * tn * itemsize
                 + tm * tn * 4)
    vmem_limit = min(int(vmem_need * 1.5) + (1 << 20), 32 * 1024 * 1024)

    grid = (M // tm, N // tn, K // tk)
    out = pl.pallas_call(
        _linear_stack_sum_tiled_kernel,
        out_shape=jax.ShapeDtypeStruct((M, N), x.dtype),
        grid_spec=pltpu.PrefetchScalarGridSpec(
            num_scalar_prefetch=0,
            grid=grid,
            in_specs=[
                pl.BlockSpec((tm, tk), lambda i, j, k: (i, k)),   # x tile
                pl.BlockSpec((tn, tk), lambda i, j, k: (j, k)),   # W tile (OUT, IN)
                pl.BlockSpec((1, tn), lambda i, j, k: (0, j)),    # bias tile
            ],
            out_specs=pl.BlockSpec((tm, tn), lambda i, j, k: (i, j)),
            scratch_shapes=[pltpu.VMEM((tm, tn), jnp.float32)],
        ),
        compiler_params=pltpu.CompilerParams(
            dimension_semantics=("parallel", "parallel", "arbitrary"),
            vmem_limit_bytes=vmem_limit,
        ),
    )(xp, wp, bp)
    return out[:B, :OUT]


@functools.partial(jax.jit)
def model_forward(x, weight, bias):
    """y = 4 * (x @ weight.T + bias) == Linear -> stack x4 -> sum(dim=0).

    x:      (B, IN)
    weight: (OUT, IN)   (torch.nn.Linear layout)
    bias:   (OUT,)
    """
    B, IN = x.shape
    OUT = weight.shape[0]
    # Shapes are static under jit: tiny problems take the un-padded single-shot
    # VPU kernel; large ones take the tiled MXU pipeline.
    if IN <= 32 and B <= 256 and OUT <= 512:
        return _small_path(x, weight, bias)
    return _tiled_path(x, weight, bias)


if __name__ == "__main__":
    key = jax.random.PRNGKey(0)
    kx, kw, kb = jax.random.split(key, 3)

    # Shapes implied by the PyTorch module: x = torch.randn(2, 4), Linear(4, 2)
    B, IN, OUT = 2, 4, 2
    x = jax.random.normal(kx, (B, IN), dtype=jnp.float32)

    # Deterministic params (mimics nn.Linear uniform(-1/sqrt(in), 1/sqrt(in)))
    bound = 1.0 / (IN ** 0.5)
    weight = jax.random.uniform(kw, (OUT, IN), minval=-bound, maxval=bound,
                                dtype=jnp.float32)
    bias = jax.random.uniform(kb, (OUT,), minval=-bound, maxval=bound,
                              dtype=jnp.float32)

    out = jax.block_until_ready(model_forward(x, weight, bias))

    # Reference check in plain JAX
    ref = 4.0 * (x @ weight.T + bias)
    assert out.shape == (B, OUT)
    assert jnp.allclose(out, ref, atol=1e-5, rtol=1e-5)

    print("KERNEL_OK")
</pallas_src>

<mosaic_0001>
module attributes {stable_mosaic.version = 11 : i64} {
  func.func @_linear_stack_sum_small_kernel(%arg0: memref<2x4xf32, #tpu.memory_space<vmem>>, %arg1: memref<4x2xf32, #tpu.memory_space<vmem>>, %arg2: memref<1x2xf32, #tpu.memory_space<vmem>>, %arg3: memref<2x2xf32, #tpu.memory_space<vmem>>) attributes {dimension_semantics = [], scalar_prefetch = 0 : i64, scratch_operands = 0 : i64, tpu.core_type = #tpu.core_type<tc>} {
    %c0 = arith.constant 0 : index
    %c0_0 = arith.constant 0 : index
    %0 = vector.load %arg0[%c0, %c0_0] : memref<2x4xf32, #tpu.memory_space<vmem>>, vector<2x4xf32>
    %c0_1 = arith.constant 0 : index
    %c0_2 = arith.constant 0 : index
    %1 = vector.load %arg1[%c0_1, %c0_2] : memref<4x2xf32, #tpu.memory_space<vmem>>, vector<4x2xf32>
    %c0_3 = arith.constant 0 : index
    %c0_4 = arith.constant 0 : index
    %2 = vector.load %arg2[%c0_3, %c0_4] : memref<1x2xf32, #tpu.memory_space<vmem>>, vector<1x2xf32>
    %3 = vector.extract_strided_slice %0 {offsets = [0, 0], sizes = [2, 1], strides = [1, 1]} : vector<2x4xf32> to vector<2x1xf32>
    %4 = vector.extract_strided_slice %1 {offsets = [0, 0], sizes = [1, 2], strides = [1, 1]} : vector<4x2xf32> to vector<1x2xf32>
    %5 = vector.broadcast %3 : vector<2x1xf32> to vector<2x2xf32>
    %6 = vector.broadcast %4 : vector<1x2xf32> to vector<2x2xf32>
    %7 = arith.mulf %5, %6 : vector<2x2xf32>
    %8 = vector.extract_strided_slice %0 {offsets = [0, 1], sizes = [2, 1], strides = [1, 1]} : vector<2x4xf32> to vector<2x1xf32>
    %9 = vector.extract_strided_slice %1 {offsets = [1, 0], sizes = [1, 2], strides = [1, 1]} : vector<4x2xf32> to vector<1x2xf32>
    %10 = vector.broadcast %8 : vector<2x1xf32> to vector<2x2xf32>
    %11 = vector.broadcast %9 : vector<1x2xf32> to vector<2x2xf32>
    %12 = arith.mulf %10, %11 : vector<2x2xf32>
    %13 = arith.addf %7, %12 : vector<2x2xf32>
    %14 = vector.extract_strided_slice %0 {offsets = [0, 2], sizes = [2, 1], strides = [1, 1]} : vector<2x4xf32> to vector<2x1xf32>
    %15 = vector.extract_strided_slice %1 {offsets = [2, 0], sizes = [1, 2], strides = [1, 1]} : vector<4x2xf32> to vector<1x2xf32>
    %16 = vector.broadcast %14 : vector<2x1xf32> to vector<2x2xf32>
    %17 = vector.broadcast %15 : vector<1x2xf32> to vector<2x2xf32>
    %18 = arith.mulf %16, %17 : vector<2x2xf32>
    %19 = arith.addf %13, %18 : vector<2x2xf32>
    %20 = vector.extract_strided_slice %0 {offsets = [0, 3], sizes = [2, 1], strides = [1, 1]} : vector<2x4xf32> to vector<2x1xf32>
    %21 = vector.extract_strided_slice %1 {offsets = [3, 0], sizes = [1, 2], strides = [1, 1]} : vector<4x2xf32> to vector<1x2xf32>
    %22 = vector.broadcast %20 : vector<2x1xf32> to vector<2x2xf32>
    %23 = vector.broadcast %21 : vector<1x2xf32> to vector<2x2xf32>
    %24 = arith.mulf %22, %23 : vector<2x2xf32>
    %25 = arith.addf %19, %24 : vector<2x2xf32>
    %26 = vector.broadcast %2 : vector<1x2xf32> to vector<2x2xf32>
    %27 = arith.addf %25, %26 : vector<2x2xf32>
    %cst = arith.constant 4.000000e+00 : f32
    %28 = vector.broadcast %cst : f32 to vector<2x2xf32>
    %29 = arith.mulf %28, %27 : vector<2x2xf32>
    %c0_5 = arith.constant 0 : index
    %c0_6 = arith.constant 0 : index
    %30 = vector.load %arg3[%c0_5, %c0_6] : memref<2x2xf32, #tpu.memory_space<vmem>>, vector<2x2xf32>
    tpu.vector_store %arg3[%c0_5, %c0_6], %29 {strides = array<i32>} : memref<2x2xf32, #tpu.memory_space<vmem>>, vector<2x2xf32>,
    return
  }
}

</mosaic_0001>

<bundles_post_ra>
// kernel: model_forward.1
= control target key start
LH: loop header
LB: loop body
LE: loop exit
PB: predicated region body
PF: predicated region fallthrough
CT: control target
= control target key end

     0   :  { %v117_v1 = vmov 0   ;;  %v118_v2 = vmov 2   ;;  %s163_s0 = inlined_call_operand.vmem [shape: f32[2,4], index: 0, kind: input, shape index: {}]   ;;  %s164_s1 = inlined_call_operand.vmem [shape: f32[4,2], index: 1, kind: input, shape index: {}]   ;;  %s165_s2 = inlined_call_operand.vmem [shape: f32[1,2], index: 2, kind: input, shape index: {}]   ;;  %s166_s3 = inlined_call_operand.hbm [shape: f32[2,2], index: 3, kind: output, shape index: {}]  }
   0x1   :  { %v15_v0 = vld [vmem:[%s163_s0] sm:$0x3]  ;;  %88 = vset.pattern.permute.xlu0 %v117_v1  ;;  %90 = vset.pattern.permute.xlu1 %v118_v2 }
   0x2   :  { %8 = vsyncpa [#allocation3], 0  ;;  %20 = vperm.xlu0 %88, %v15_v0   ;;  %39 = vperm.xlu1 %90, %v15_v0   ;;  %v119_v3 = vmov 1   ;;  %v120_v4 = vmov 3   ;;  %v23_v5 = vlaneseq  ;;  %v16_v9 = vld [vmem:[%s164_s1] sm:$0xf] }
   0x3   :  { %v82_v26 = vld [vmem:[%s165_s2] ss:$0 sm:$0xff]  ;;  %s121_s1 = smov [#allocation2]   ;;  %vm66_vm0 = vcmask 9216  }
   0x4   :  { %v24_v6 = vshrl.u32 %v23_v5, 7  ;;  %s74_s17 = sshll.u32 %s121_s1, 4  ;;  %s75_s17 = int_to_ptr.vmem [resolvable:$true] %s74_s17 }
   0x5   :  { %s93_s18 = scalar_lea.vmem %s75_s17, 32  ;;  %p98_p1 = scmp.lt.s32.totalorder %s75_s17, %s75_s17 }
   0x6   :  { %89 = vset.pattern.permute.xlu0 %v119_v3  ;;  %91 = vset.pattern.permute.xlu1 %v120_v4  ;;  %v25_v7 = vsub.s32 0, %v24_v6  ;;  %v34_v8 = vsub.s32 1, %v24_v6  ;;  %v44_v11 = vsub.s32 2, %v24_v6  ;;  %v54_v13 = vsub.s32 3, %v24_v6  ;;  %p94_p0 = scmp.ne.s32.totalorder %s75_s17, %s93_s18  ;;  %p99_p2 = scmp.lt.s32.totalorder %s93_s18, %s93_s18 }
   0x7   :  { %29 = vperm.xlu0 %89, %v15_v0   ;;  %49 = vperm.xlu1 %91, %v15_v0  }
   0x8   :  { %v26_v14 = vrot.slane %v16_v9, %v25_v7  ;;  %v35_v15 = vrot.slane %v16_v9, %v34_v8  ;;  %v45_v16 = vrot.slane %v16_v9, %v44_v11  ;;  %v55_v17 = vrot.slane %v16_v9, %v54_v13  ;;  %p100_p3 = por %p99_p2, %p98_p1 }
   0xa   :  { %p101_p4 = pnand %p100_p3, %p94_p0 }
   0xb   :  { %92 = vset.pattern.permute.xlu0 %v120_v4 }
  0x81   :  { %v21_v10 = vpop.permute.xlu0 %20  ;;  %v40_v12 = vpop.permute.xlu1 %39 }
  0x82   :  { %v27_v20 = vmul.f32 %v26_v14, %v21_v10  ;;  %v46_v22 = vmul.f32 %v45_v16, %v40_v12 }
  0x86   :  { %v30_v18 = vpop.permute.xlu0 %29  ;;  %v50_v19 = vpop.permute.xlu1 %49 }
  0x87   :  { %v36_v21 = vmul.f32 %v35_v15, %v30_v18  ;;  %v56_v24 = vmul.f32 %v55_v17, %v50_v19 }
  0x89   :  { %v37_v23 = vadd.f32 %v36_v21, %v27_v20 }
  0x8b   :  { %v47_v25 = vadd.f32 %v46_v22, %v37_v23 }
  0x8d   :  { %v57_v27 = vadd.f32 %v56_v24, %v47_v25 }
  0x8f   :  { %v64_v28 = vadd.f32 %v82_v26, %v57_v27 }
  0x91   :  { %v65_v29 = vmul.f32 4.0, %v64_v28 }
  0x93   :  { %67 = vst.msk [vmem:[#allocation2] sm:$0x3] %vm66_vm0, %v65_v29 }
  0x94   :  { %104 = shalt.err (!%p101_p4)
}
  0x95   :  { %s105_s21 = scalar_lea.hbm %s166_s3, 32 }
  0x96   :  { %p106_p5 = scmp.ne.s32.totalorder %s166_s3, %s105_s21  ;;  %p109_p6 = scmp.lt.u32.totalorder %s105_s21, %s166_s3 }
  0x98   :  { %p111_p7 = pnand %p109_p6, %p106_p5 }
  0x9a   :  { %114 = shalt.err (!%p111_p7)
}
  0x9b   :  { %77 = dma.vmem_to_hbm [thread:$0]  %s75_s17, 32, %s166_s3, [#allocation3]  }
  0x9c   :  { %115 = dma.done.wait [#allocation3], 32  }
  0x9d   :  { %116 = vsyncadd [#allocation3], 4294967264 }
  0x9e   :  { %81 = vsyncpa [#allocation3], 1 }

</bundles_post_ra>
